<compile_context>
chip_gen: v7x
topology: tpu7x:2x2x1
jax: 0.10.0
libtpu: 0.0.40
codegen_flags: <defaults>
</compile_context>

<pallas_src>
import jax
import jax.numpy as jnp
from jax.experimental import pallas as pl
from jax.experimental.pallas import tpu as pltpu


def _brightness_kernel(level_ref, x_ref, o_ref):
    # level_ref is a scalar-prefetch ref in SMEM, shape (1,)
    level = level_ref[0]
    o_ref[...] = jnp.clip(x_ref[...] * level, 0.0, 1.0)


def brightness(img: jax.Array, level) -> jax.Array:
    """Pallas equivalent of Brightness().forward(img, level) for float tensors."""
    # Host-side validation only when `level` is a concrete Python number
    # (avoids TracerBoolConversionError under jit/vmap).
    if isinstance(level, (int, float)) and level < 0:
        raise ValueError("Level must be greater than 0.")

    orig_shape = img.shape
    dtype = img.dtype
    total = img.size

    # Lane-dense layout: columns = 1024 (multiple of 128), rows tiled in blocks
    # of TR rows (multiple of 8). One f32 block = TR * 1024 * 4 B (<= 2 MiB).
    LANES = 1024
    TR_MAX = 512  # 512 * 1024 * 4 B = 2 MiB per block

    rows_needed = -(-total // LANES)                      # cdiv
    tr = min(TR_MAX, max(8, ((rows_needed + 7) // 8) * 8))  # multiple of 8
    rows = ((rows_needed + tr - 1) // tr) * tr            # pad rows to multiple of tr
    padded_total = rows * LANES

    flat = img.reshape(-1)
    if padded_total != total:
        flat = jnp.pad(flat, (0, padded_total - total))
    x2d = flat.reshape(rows, LANES)

    level_arr = jnp.asarray([level], dtype=dtype)

    block_bytes = tr * LANES * x2d.dtype.itemsize
    # double-buffered input + output blocks, plus slack; safe on v7x (64 MiB VMEM)
    vmem_limit = min(2 * 2 * block_bytes + (8 << 20), 64 << 20)

    out2d = pl.pallas_call(
        _brightness_kernel,
        out_shape=jax.ShapeDtypeStruct((rows, LANES), dtype),
        grid_spec=pltpu.PrefetchScalarGridSpec(
            num_scalar_prefetch=1,
            grid=(rows // tr,),
            in_specs=[pl.BlockSpec((tr, LANES), lambda i, lvl: (i, 0))],
            out_specs=pl.BlockSpec((tr, LANES), lambda i, lvl: (i, 0)),
        ),
        compiler_params=pltpu.CompilerParams(
            dimension_semantics=("parallel",),
            vmem_limit_bytes=vmem_limit,
        ),
    )(level_arr, x2d)

    out_flat = out2d.reshape(-1)
    if padded_total != total:
        out_flat = out_flat[:total]
    return out_flat.reshape(orig_shape)


if __name__ == "__main__":
    key = jax.random.PRNGKey(0)
    # NCHW image in [0, 1], like a normalized PyTorch image tensor.
    x = jax.random.uniform(key, (2, 4, 16, 16), dtype=jnp.float32)
    level = 1.3

    out = brightness(x, level)
    jax.block_until_ready(out)

    # Reference check against plain JAX semantics of adjust_brightness (float path).
    ref = jnp.clip(x * level, 0.0, 1.0)
    assert out.shape == x.shape and out.dtype == x.dtype
    assert jnp.allclose(out, ref, atol=1e-6), "mismatch vs reference"

    # Also exercise a shape whose H*W is NOT a multiple of 128 (padding path).
    x2 = jax.random.uniform(jax.random.PRNGKey(1), (2, 3, 30, 30), dtype=jnp.float32)
    out2 = brightness(x2, 0.6)
    jax.block_until_ready(out2)
    assert jnp.allclose(out2, jnp.clip(x2 * 0.6, 0.0, 1.0), atol=1e-6), "mismatch (padded path)"

    print("KERNEL_OK")
</pallas_src>

<mosaic_0001>
module attributes {stable_mosaic.version = 11 : i64} {
  func.func @_brightness_kernel(%arg0: i32, %arg1: memref<1xf32, #tpu.memory_space<smem>>, %arg2: memref<8x1024xf32, #tpu.memory_space<vmem>>, %arg3: memref<8x1024xf32, #tpu.memory_space<vmem>>) attributes {dimension_semantics = [#tpu.dimension_semantics<parallel>], iteration_bounds = array<i64: 1>, scalar_prefetch = 1 : i64, scratch_operands = 0 : i64, tpu.core_type = #tpu.core_type<tc>, window_params = [{transform_indices = @transform_0, window_bounds = array<i64: 8, 1024>}, {transform_indices = @transform_1, window_bounds = array<i64: 8, 1024>}]} {
    %c0 = arith.constant 0 : index
    %0 = memref.load %arg1[%c0] : memref<1xf32, #tpu.memory_space<smem>>
    %c0_0 = arith.constant 0 : index
    %c0_1 = arith.constant 0 : index
    %1 = vector.load %arg2[%c0_0, %c0_1] : memref<8x1024xf32, #tpu.memory_space<vmem>>, vector<8x1024xf32>
    %2 = vector.broadcast %0 : f32 to vector<8x1024xf32>
    %3 = arith.mulf %1, %2 : vector<8x1024xf32>
    %cst = arith.constant 0.000000e+00 : f32
    %cst_2 = arith.constant 1.000000e+00 : f32
    %4 = vector.broadcast %cst : f32 to vector<8x1024xf32>
    %5 = arith.maximumf %4, %3 : vector<8x1024xf32>
    %6 = vector.broadcast %cst_2 : f32 to vector<8x1024xf32>
    %7 = arith.minimumf %6, %5 : vector<8x1024xf32>
    %c0_3 = arith.constant 0 : index
    %c0_4 = arith.constant 0 : index
    %8 = vector.load %arg3[%c0_3, %c0_4] : memref<8x1024xf32, #tpu.memory_space<vmem>>, vector<8x1024xf32>
    tpu.vector_store %arg3[%c0_3, %c0_4], %7 {strides = array<i32>} : memref<8x1024xf32, #tpu.memory_space<vmem>>, vector<8x1024xf32>,
    return
  }
  func.func @transform_0(%arg0: i32, %arg1: memref<1xf32, #tpu.memory_space<smem>>) -> (i32, i32) {
    %c0_i32 = arith.constant 0 : i32
    %c0_i32_0 = arith.constant 0 : i32
    return %arg0, %c0_i32 : i32, i32
  }
  func.func @transform_1(%arg0: i32, %arg1: memref<1xf32, #tpu.memory_space<smem>>) -> (i32, i32) {
    %c0_i32 = arith.constant 0 : i32
    %c0_i32_0 = arith.constant 0 : i32
    return %arg0, %c0_i32 : i32, i32
  }
}

</mosaic_0001>

<bundles_post_ra>
// kernel: tpu_custom_call.1
= control target key start
LH: loop header
LB: loop body
LE: loop exit
PB: predicated region body
PF: predicated region fallthrough
CT: control target
= control target key end

     0   :  { %8 = vsyncpa [#allocation5], 0  ;;  %s174_s0 = inlined_call_operand.<no memory space> [shape: f32[1], index: 0, kind: input, shape index: {}]   ;;  %s175_s1 = inlined_call_operand.hbm [shape: f32[8,1024], index: 1, kind: input, shape index: {}]   ;;  %s176_s2 = inlined_call_operand.hbm [shape: f32[8,1024], index: 2, kind: output, shape index: {}]  }
   0x1   :  { %9 = vsyncpa [#allocation6], 0  ;;  %s130_s9 = smov [#allocation4]   ;;  %s82_s13 = scalar_lea.hbm %s175_s1, 1024 }
   0x2   :  { %s16_s10 = sshll.u32 %s130_s9, 4  ;;  %p83_p0 = scmp.ne.s32.totalorder %s175_s1, %s82_s13  ;;  %s17_s10 = int_to_ptr.vmem [resolvable:$true] %s16_s10 }
   0x3   :  { %p86_p1 = scmp.lt.u32.totalorder %s82_s13, %s175_s1 }
   0x5   :  { %p88_p2 = pnand %p86_p1, %p83_p0 }
   0x7   :  { %91 = shalt.err (!%p88_p2)
}
   0x8   :  { %s92_s18 = scalar_lea.vmem %s17_s10, 1024  ;;  %p97_p4 = scmp.lt.s32.totalorder %s17_s10, %s17_s10 }
   0x9   :  { %p93_p3 = scmp.ne.s32.totalorder %s17_s10, %s92_s18  ;;  %p98_p5 = scmp.lt.s32.totalorder %s92_s18, %s92_s18 }
   0xb   :  { %p99_p6 = por %p98_p5, %p97_p4 }
   0xd   :  { %p100_p7 = pnand %p99_p6, %p93_p3 }
   0xf   :  { %103 = shalt.err (!%p100_p7)
}
  0x10   :  { %19 = dma.hbm_to_vmem [thread:$0]  %s175_s1, 1024, %s17_s10, [#allocation5]  }
  0x11   :  { %126 = dma.done.wait [#allocation5], 1024  }
  0x12   :  { %127 = vsyncadd [#allocation5], 4294966272  ;;  %v32_v0 = vstv %s174_s0  ;;  %v24_v1 = vld [vmem:[#allocation4] sm:$0xff]  ;;  %v25_v2 = vld [vmem:[#allocation4 + $0x8] sm:$0xff]  ;;  %s131_s0 = smov [#allocation7]  }
  0x13   :  { %v26_v3 = vld [vmem:[#allocation4 + $0x10] sm:$0xff]  ;;  %v33_v4 = vmul.f32 %v32_v0, %v24_v1  ;;  %v34_v5 = vmul.f32 %v32_v0, %v25_v2  ;;  %v27_v7 = vld [vmem:[#allocation4 + $0x18] sm:$0xff]  ;;  %v28_v8 = vld [vmem:[#allocation4 + $0x20] sm:$0xff]  ;;  %s71_s1 = sshll.u32 %s131_s0, 4  ;;  %s72_s1 = int_to_ptr.vmem [resolvable:$true] %s71_s1 }
  0x14   :  { %v35_v6 = vmul.f32 %v32_v0, %v26_v3  ;;  %v29_v9 = vld [vmem:[#allocation4 + $0x28] sm:$0xff]  ;;  %v36_v10 = vmul.f32 %v32_v0, %v27_v7  ;;  %v37_v11 = vmul.f32 %v32_v0, %v28_v8  ;;  %v30_v13 = vld [vmem:[#allocation4 + $0x30] sm:$0xff]  ;;  %v31_v14 = vld [vmem:[#allocation4 + $0x38] sm:$0xff]  ;;  %s104_s23 = scalar_lea.vmem %s72_s1, 1024  ;;  %p109_p9 = scmp.lt.s32.totalorder %s72_s1, %s72_s1 }
  0x15   :  { %v38_v12 = vmul.f32 %v32_v0, %v29_v9  ;;  %v41_v15 = vmax.f32 %v33_v4, 0.0  ;;  %v42_v16 = vmax.f32 %v34_v5, 0.0  ;;  %v39_v18 = vmul.f32 %v32_v0, %v30_v13  ;;  %p105_p8 = scmp.ne.s32.totalorder %s72_s1, %s104_s23  ;;  %p110_p10 = scmp.lt.s32.totalorder %s104_s23, %s104_s23 }
  0x16   :  { %v43_v17 = vmax.f32 %v35_v6, 0.0  ;;  %v44_v19 = vmax.f32 %v36_v10, 0.0  ;;  %v45_v20 = vmax.f32 %v37_v11, 0.0  ;;  %v40_v22 = vmul.f32 %v32_v0, %v31_v14 }
  0x17   :  { %v46_v21 = vmax.f32 %v38_v12, 0.0  ;;  %v49_v23 = vmin.f32 %v41_v15, 1.0  ;;  %v50_v24 = vmin.f32 %v42_v16, 1.0  ;;  %v47_v26 = vmax.f32 %v39_v18, 0.0  ;;  %p111_p11 = por %p110_p10, %p109_p9 }
  0x18   :  { %v51_v25 = vmin.f32 %v43_v17, 1.0  ;;  %v52_v27 = vmin.f32 %v44_v19, 1.0  ;;  %v53_v28 = vmin.f32 %v45_v20, 1.0  ;;  %v48_v30 = vmax.f32 %v40_v22, 0.0 }
  0x19   :  { %v54_v29 = vmin.f32 %v46_v21, 1.0  ;;  %57 = vst [vmem:[#allocation7] sm:$0xff] %v49_v23  ;;  %58 = vst [vmem:[#allocation7 + $0x8] sm:$0xff] %v50_v24  ;;  %v55_v31 = vmin.f32 %v47_v26, 1.0  ;;  %p112_p12 = pnand %p111_p11, %p105_p8 }
  0x1a   :  { %59 = vst [vmem:[#allocation7 + $0x10] sm:$0xff] %v51_v25  ;;  %60 = vst [vmem:[#allocation7 + $0x18] sm:$0xff] %v52_v27  ;;  %v56_v32 = vmin.f32 %v48_v30, 1.0 }
  0x1b   :  { %61 = vst [vmem:[#allocation7 + $0x20] sm:$0xff] %v53_v28  ;;  %62 = vst [vmem:[#allocation7 + $0x28] sm:$0xff] %v54_v29 }
  0x1c   :  { %63 = vst [vmem:[#allocation7 + $0x30] sm:$0xff] %v55_v31  ;;  %64 = vst [vmem:[#allocation7 + $0x38] sm:$0xff] %v56_v32 }
  0x1d   :  { %115 = shalt.err (!%p112_p12)
}
  0x1e   :  { %s116_s26 = scalar_lea.hbm %s176_s2, 1024 }
  0x1f   :  { %p117_p13 = scmp.ne.s32.totalorder %s176_s2, %s116_s26  ;;  %p120_p0 = scmp.lt.u32.totalorder %s116_s26, %s176_s2 }
  0x21   :  { %p122_p1 = pnand %p120_p0, %p117_p13 }
  0x23   :  { %125 = shalt.err (!%p122_p1)
}
  0x24   :  { %74 = dma.vmem_to_hbm [thread:$0]  %s72_s1, 1024, %s176_s2, [#allocation6]  }
  0x25   :  { %128 = dma.done.wait [#allocation6], 1024  }
  0x26   :  { %129 = vsyncadd [#allocation6], 4294966272 }
  0x27   :  { %78 = vsyncpa [#allocation5], 1 }
  0x28   :  { %79 = vsyncpa [#allocation6], 1 }

</bundles_post_ra>
